<compile_context>
chip_gen: v7x
topology: tpu7x:2x2x1
jax: 0.10.0
libtpu: 0.0.40
codegen_flags: <defaults>
</compile_context>

<pallas_src>
import functools

import jax
import jax.numpy as jnp
from jax.experimental import pallas as pl
from jax.experimental.pallas import tpu as pltpu


def _channel_attention_kernel(
    x_ref,       # (Bt, C*HWp)  batch-row tile; lanes = channel-major flattened spatial
    w1m_ref,     # (C, Hid)     fc_MaxPool Linear-1 weight, transposed to (in, out)
    b1m_ref,     # (1, Hid)
    w2m_ref,     # (Hid, C)     fc_MaxPool Linear-2 weight, transposed
    b2m_ref,     # (1, C)
    w1a_ref,     # (C, Hid)     fc_AvgPool branch
    b1a_ref,     # (1, Hid)
    w2a_ref,     # (Hid, C)
    b2a_ref,     # (1, C)
    out_ref,     # (Bt, C*HWp)
    *, C, HW, HWP):
    bt = x_ref.shape[0]
    col = jax.lax.broadcasted_iota(jnp.int32, (bt, C), 1)   # channel index per column

    # ---- Adaptive{Max,Avg}Pool2d(1): per-channel lane reductions, f32 accumulation ----
    max_in = jnp.zeros((bt, C), jnp.float32)
    avg_in = jnp.zeros((bt, C), jnp.float32)
    inv_hw = 1.0 / float(HW)
    for c in range(C):                                       # static, small C
        chunk = x_ref[:, c * HWP:(c + 1) * HWP].astype(jnp.float32)   # (Bt, HWp)
        if HWP != HW:
            # Zero-padded lanes: mask with -inf for the max; zeros are harmless for the sum.
            lane = jax.lax.broadcasted_iota(jnp.int32, chunk.shape, 1)
            chunk_for_max = jnp.where(lane < HW, chunk, -jnp.inf)
        else:
            chunk_for_max = chunk
        m_c = jnp.max(chunk_for_max, axis=-1, keepdims=True)           # (Bt, 1)
        a_c = jnp.sum(chunk, axis=-1, keepdims=True) * inv_hw          # (Bt, 1), true-HW mean
        # Place into column c of the (Bt, C) pooled matrices via a lane select
        # (robust lowering: broadcast + where only, no minor-dim concat/reshape).
        max_in = jnp.where(col == c, m_c, max_in)
        avg_in = jnp.where(col == c, a_c, avg_in)

    # ---- MLP branches, batched over the Bt rows of the block (one matmul per layer) ----
    def mlp(v, w1t_ref, b1_ref, w2t_ref, b2_ref):
        h = jnp.dot(v, w1t_ref[...], preferred_element_type=jnp.float32,
                    precision=jax.lax.Precision.HIGHEST) + b1_ref[...]
        h = jnp.maximum(h, 0.0)                              # ReLU
        o = jnp.dot(h, w2t_ref[...], preferred_element_type=jnp.float32,
                    precision=jax.lax.Precision.HIGHEST) + b2_ref[...]
        return jax.nn.sigmoid(o)                             # (Bt, C)

    max_w = mlp(max_in, w1m_ref, b1m_ref, w2m_ref, b2m_ref)
    avg_w = mlp(avg_in, w1a_ref, b1a_ref, w2a_ref, b2a_ref)
    # NOTE: the double sigmoid (per-branch Sigmoid + sigmoid of the sum) matches the
    # original PyTorch module exactly (nn.Sequential(..., Sigmoid) then self.sigmoid).
    mc = jax.nn.sigmoid(max_w + avg_w)                       # (Bt, C), f32

    # ---- Mc * x: per-channel lane-broadcast multiply, stored in the streaming dtype ----
    for c in range(C):
        w_c = jnp.sum(jnp.where(col == c, mc, 0.0), axis=-1, keepdims=True)  # (Bt, 1)
        sl = slice(c * HWP, (c + 1) * HWP)
        out_ref[:, sl] = x_ref[:, sl] * w_c.astype(out_ref.dtype)


def _plan_block_rows(B, C, HWP, x_itemsize, param_bytes):
    """Pick rows-per-block (Bt) and a VMEM limit that covers the real working set."""
    try:
        vmem_cap = int(pltpu.get_tpu_info().vmem_capacity_bytes)  # 128 MiB v5e/v6e, 64 MiB v7x
    except Exception:
        vmem_cap = 64 << 20                                       # conservative fallback
    budget = int(vmem_cap * 0.45)          # working-set target; leaves compiler headroom

    row_stream = C * HWP * x_itemsize      # one batch row in the streamed dtype
    chunk_f32 = HWP * 4                    # per-row bytes of one f32 chunk temp
    fixed = 2 * param_bytes + (1 << 20)    # resident (double-buffered) params + misc temps

    def need(bt):
        # 2x double-buffered input + output blocks, plus ~2 live f32 chunk temps in-kernel.
        return 4 * bt * row_stream + 2 * bt * chunk_f32 + fixed

    if B <= 8:
        bt = B                             # block sublane dim == full batch dim (allowed)
    else:
        per_row = 4 * row_stream + 2 * chunk_f32
        fit = max(8, ((budget - fixed) // per_row // 8) * 8)   # largest Bt (mult. of 8) that fits
        bt = max(8, min(fit, (min(B, 2048) // 8) * 8))
    # TODO(synk): if need(bt) still exceeds the budget at the minimum bt (very large H*W),
    # switch to an HW-tiled two-pass kernel (pooled accumulators + second streaming pass,
    # 2R+1W HBM traffic) instead of relying on compiler spills.
    vmem_limit = int(min(max(need(bt), 16 << 20), int(vmem_cap * 0.9)))
    return bt, vmem_limit


def channel_attention_forward(x, params):
    """x: (B, C, H, W); params: PyTorch nn.Linear layout (weights (out,in), biases (out,))."""
    B, C, H, W = x.shape
    HW = H * W
    HWP = ((HW + 127) // 128) * 128        # lane-dense per-channel width (pad masked in-kernel)

    x3 = x.reshape(B, C, HW)
    if HWP != HW:
        x3 = jnp.pad(x3, ((0, 0), (0, 0), (0, HWP - HW)))
    x2 = x3.reshape(B, C * HWP)

    def to_kernel_layout(w, b):
        return w.T, b.reshape(1, -1)       # (in, out) weight, (1, out) bias row

    w1m, b1m = to_kernel_layout(params["w1_max"], params["b1_max"])
    w2m, b2m = to_kernel_layout(params["w2_max"], params["b2_max"])
    w1a, b1a = to_kernel_layout(params["w1_avg"], params["b1_avg"])
    w2a, b2a = to_kernel_layout(params["w2_avg"], params["b2_avg"])
    weights = (w1m, b1m, w2m, b2m, w1a, b1a, w2a, b2a)
    param_bytes = sum(int(p.size) * jnp.dtype(p.dtype).itemsize for p in weights)

    bt, vmem_limit = _plan_block_rows(B, C, HWP, jnp.dtype(x.dtype).itemsize, param_bytes)

    x_spec = pl.BlockSpec((bt, C * HWP), lambda i: (i, 0))

    def const_spec(a):
        # Full array, same block index every grid step -> DMA'd once, stays resident.
        return pl.BlockSpec(a.shape, lambda i: (0,) * a.ndim)

    kernel = functools.partial(_channel_attention_kernel, C=C, HW=HW, HWP=HWP)

    # TODO(synk): on v7x, shard the batch grid across the 2 TensorCores with
    # pltpu.CORE_PARALLEL (or an explicit core_map over create_tensorcore_mesh);
    # plain "parallel" is kept here because it compiles on every generation.
    out2 = pl.pallas_call(
        kernel,
        out_shape=jax.ShapeDtypeStruct((B, C * HWP), x.dtype),
        grid=(pl.cdiv(B, bt),),
        in_specs=[x_spec] + [const_spec(a) for a in weights],
        out_specs=x_spec,
        compiler_params=pltpu.CompilerParams(
            dimension_semantics=("parallel",),
            vmem_limit_bytes=vmem_limit,
        ),
    )(x2, *weights)

    out3 = out2.reshape(B, C, HWP)
    if HWP != HW:
        out3 = out3[:, :, :HW]
    return out3.reshape(B, C, H, W)


def init_params(key, in_channel, r=0.5):
    hidden = int(in_channel * r)
    if hidden < 1:
        raise ValueError(f"in_channel * r must be >= 1 (got hidden={hidden})")
    keys = jax.random.split(key, 8)

    def lin(kw, kb, fan_in, fan_out):
        # nn.Linear-style uniform init; PyTorch-native (out_features, in_features).
        bound = 1.0 / float(fan_in) ** 0.5
        w = jax.random.uniform(kw, (fan_out, fan_in), jnp.float32, -bound, bound)
        b = jax.random.uniform(kb, (fan_out,), jnp.float32, -bound, bound)
        return w, b

    w1m, b1m = lin(keys[0], keys[1], in_channel, hidden)
    w2m, b2m = lin(keys[2], keys[3], hidden, in_channel)
    w1a, b1a = lin(keys[4], keys[5], in_channel, hidden)
    w2a, b2a = lin(keys[6], keys[7], hidden, in_channel)
    return {
        "w1_max": w1m, "b1_max": b1m, "w2_max": w2m, "b2_max": b2m,
        "w1_avg": w1a, "b1_avg": b1a, "w2_avg": w2a, "b2_avg": b2a,
    }


def _reference_forward(x, p):
    # Pure-JAX reference matching the PyTorch module semantics.
    B, C, H, W = x.shape
    xf = x.reshape(B, C, H * W)
    max_in = jnp.max(xf, axis=-1)                      # (B, C)
    avg_in = jnp.mean(xf, axis=-1)                     # (B, C)

    def mlp(v, w1, b1, w2, b2):
        h = jnp.maximum(
            jnp.dot(v, w1.T, precision=jax.lax.Precision.HIGHEST) + b1, 0.0)
        return jax.nn.sigmoid(
            jnp.dot(h, w2.T, precision=jax.lax.Precision.HIGHEST) + b2)

    mw = mlp(max_in, p["w1_max"], p["b1_max"], p["w2_max"], p["b2_max"])
    aw = mlp(avg_in, p["w1_avg"], p["b1_avg"], p["w2_avg"], p["b2_avg"])
    weight = jax.nn.sigmoid(mw + aw)
    return weight[:, :, None, None] * x


if __name__ == "__main__":
    key = jax.random.PRNGKey(0)
    k_x, k_p = jax.random.split(key)

    B, C, H, W = 2, 4, 16, 16            # small NCHW shapes consistent with the module
    x = jax.random.normal(k_x, (B, C, H, W), dtype=jnp.float32)
    params = init_params(k_p, in_channel=C, r=0.5)

    out = channel_attention_forward(x, params)
    out = jax.block_until_ready(out)

    ref = _reference_forward(x, params)
    assert out.shape == (B, C, H, W)
    assert jnp.allclose(out, ref, atol=1e-5, rtol=1e-5), "mismatch vs reference"

    print("KERNEL_OK")
</pallas_src>

<mosaic_0001>
module attributes {stable_mosaic.version = 11 : i64} {
  func.func @_channel_attention_kernel(%arg0: i32, %arg1: memref<2x1024xf32, #tpu.memory_space<vmem>>, %arg2: memref<4x2xf32, #tpu.memory_space<vmem>>, %arg3: memref<1x2xf32, #tpu.memory_space<vmem>>, %arg4: memref<2x4xf32, #tpu.memory_space<vmem>>, %arg5: memref<1x4xf32, #tpu.memory_space<vmem>>, %arg6: memref<4x2xf32, #tpu.memory_space<vmem>>, %arg7: memref<1x2xf32, #tpu.memory_space<vmem>>, %arg8: memref<2x4xf32, #tpu.memory_space<vmem>>, %arg9: memref<1x4xf32, #tpu.memory_space<vmem>>, %arg10: memref<2x1024xf32, #tpu.memory_space<vmem>>) attributes {dimension_semantics = [#tpu.dimension_semantics<parallel>], iteration_bounds = array<i64: 1>, scalar_prefetch = 0 : i64, scratch_operands = 0 : i64, tpu.core_type = #tpu.core_type<tc>, window_params = [{transform_indices = @transform_0, window_bounds = array<i64: 2, 1024>}, {pipeline_mode = #tpu.pipeline_mode<synchronous>, transform_indices = @transform_1, window_bounds = array<i64: 4, 2>}, {pipeline_mode = #tpu.pipeline_mode<synchronous>, transform_indices = @transform_2, window_bounds = array<i64: 1, 2>}, {pipeline_mode = #tpu.pipeline_mode<synchronous>, transform_indices = @transform_3, window_bounds = array<i64: 2, 4>}, {pipeline_mode = #tpu.pipeline_mode<synchronous>, transform_indices = @transform_4, window_bounds = array<i64: 1, 4>}, {pipeline_mode = #tpu.pipeline_mode<synchronous>, transform_indices = @transform_5, window_bounds = array<i64: 4, 2>}, {pipeline_mode = #tpu.pipeline_mode<synchronous>, transform_indices = @transform_6, window_bounds = array<i64: 1, 2>}, {pipeline_mode = #tpu.pipeline_mode<synchronous>, transform_indices = @transform_7, window_bounds = array<i64: 2, 4>}, {pipeline_mode = #tpu.pipeline_mode<synchronous>, transform_indices = @transform_8, window_bounds = array<i64: 1, 4>}, {transform_indices = @transform_9, window_bounds = array<i64: 2, 1024>}]} {
    %0 = tpu.iota {dimensions = array<i32: 1>} : vector<2x4xi32>
    %cst = arith.constant 0.000000e+00 : f32
    %1 = vector.broadcast %cst : f32 to vector<2x4xf32>
    %cst_0 = arith.constant 0.000000e+00 : f32
    %2 = vector.broadcast %cst_0 : f32 to vector<2x4xf32>
    %c0 = arith.constant 0 : index
    %c0_1 = arith.constant 0 : index
    %3 = vector.load %arg1[%c0, %c0_1] : memref<2x1024xf32, #tpu.memory_space<vmem>>, vector<2x256xf32>
    %cst_2 = arith.constant dense<0xFF800000> : vector<2xf32>
    %4 = vector.multi_reduction <maximumf>, %3, %cst_2 [1] : vector<2x256xf32> to vector<2xf32>
    %5 = vector.shape_cast %4 : vector<2xf32> to vector<2x1xf32>
    %cst_3 = arith.constant dense<0.000000e+00> : vector<2xf32>
    %6 = vector.multi_reduction <add>, %3, %cst_3 [1] : vector<2x256xf32> to vector<2xf32>
    %7 = vector.shape_cast %6 : vector<2xf32> to vector<2x1xf32>
    %cst_4 = arith.constant 3.906250e-03 : f32
    %8 = vector.broadcast %cst_4 : f32 to vector<2x1xf32>
    %9 = arith.mulf %7, %8 : vector<2x1xf32>
    %c0_i32 = arith.constant 0 : i32
    %10 = vector.broadcast %c0_i32 : i32 to vector<2x4xi32>
    %11 = arith.cmpi eq, %0, %10 : vector<2x4xi32>
    %12 = vector.shape_cast %5 : vector<2x1xf32> to vector<2x1xf32>
    %13 = vector.broadcast %12 : vector<2x1xf32> to vector<2x4xf32>
    %14 = arith.select %11, %13, %1 : vector<2x4xi1>, vector<2x4xf32>
    %c0_i32_5 = arith.constant 0 : i32
    %15 = vector.broadcast %c0_i32_5 : i32 to vector<2x4xi32>
    %16 = arith.cmpi eq, %0, %15 : vector<2x4xi32>
    %17 = vector.shape_cast %9 : vector<2x1xf32> to vector<2x1xf32>
    %18 = vector.broadcast %17 : vector<2x1xf32> to vector<2x4xf32>
    %19 = arith.select %16, %18, %2 : vector<2x4xi1>, vector<2x4xf32>
    %c0_6 = arith.constant 0 : index
    %c256 = arith.constant 256 : index
    %20 = vector.load %arg1[%c0_6, %c256] : memref<2x1024xf32, #tpu.memory_space<vmem>>, vector<2x256xf32>
    %cst_7 = arith.constant dense<0xFF800000> : vector<2xf32>
    %21 = vector.multi_reduction <maximumf>, %20, %cst_7 [1] : vector<2x256xf32> to vector<2xf32>
    %22 = vector.shape_cast %21 : vector<2xf32> to vector<2x1xf32>
    %cst_8 = arith.constant dense<0.000000e+00> : vector<2xf32>
    %23 = vector.multi_reduction <add>, %20, %cst_8 [1] : vector<2x256xf32> to vector<2xf32>
    %24 = vector.shape_cast %23 : vector<2xf32> to vector<2x1xf32>
    %cst_9 = arith.constant 3.906250e-03 : f32
    %25 = vector.broadcast %cst_9 : f32 to vector<2x1xf32>
    %26 = arith.mulf %24, %25 : vector<2x1xf32>
    %c1_i32 = arith.constant 1 : i32
    %27 = vector.broadcast %c1_i32 : i32 to vector<2x4xi32>
    %28 = arith.cmpi eq, %0, %27 : vector<2x4xi32>
    %29 = vector.shape_cast %22 : vector<2x1xf32> to vector<2x1xf32>
    %30 = vector.broadcast %29 : vector<2x1xf32> to vector<2x4xf32>
    %31 = arith.select %28, %30, %14 : vector<2x4xi1>, vector<2x4xf32>
    %c1_i32_10 = arith.constant 1 : i32
    %32 = vector.broadcast %c1_i32_10 : i32 to vector<2x4xi32>
    %33 = arith.cmpi eq, %0, %32 : vector<2x4xi32>
    %34 = vector.shape_cast %26 : vector<2x1xf32> to vector<2x1xf32>
    %35 = vector.broadcast %34 : vector<2x1xf32> to vector<2x4xf32>
    %36 = arith.select %33, %35, %19 : vector<2x4xi1>, vector<2x4xf32>
    %c0_11 = arith.constant 0 : index
    %c512 = arith.constant 512 : index
    %37 = vector.load %arg1[%c0_11, %c512] : memref<2x1024xf32, #tpu.memory_space<vmem>>, vector<2x256xf32>
    %cst_12 = arith.constant dense<0xFF800000> : vector<2xf32>
    %38 = vector.multi_reduction <maximumf>, %37, %cst_12 [1] : vector<2x256xf32> to vector<2xf32>
    %39 = vector.shape_cast %38 : vector<2xf32> to vector<2x1xf32>
    %cst_13 = arith.constant dense<0.000000e+00> : vector<2xf32>
    %40 = vector.multi_reduction <add>, %37, %cst_13 [1] : vector<2x256xf32> to vector<2xf32>
    %41 = vector.shape_cast %40 : vector<2xf32> to vector<2x1xf32>
    %cst_14 = arith.constant 3.906250e-03 : f32
    %42 = vector.broadcast %cst_14 : f32 to vector<2x1xf32>
    %43 = arith.mulf %41, %42 : vector<2x1xf32>
    %c2_i32 = arith.constant 2 : i32
    %44 = vector.broadcast %c2_i32 : i32 to vector<2x4xi32>
    %45 = arith.cmpi eq, %0, %44 : vector<2x4xi32>
    %46 = vector.shape_cast %39 : vector<2x1xf32> to vector<2x1xf32>
    %47 = vector.broadcast %46 : vector<2x1xf32> to vector<2x4xf32>
    %48 = arith.select %45, %47, %31 : vector<2x4xi1>, vector<2x4xf32>
    %c2_i32_15 = arith.constant 2 : i32
    %49 = vector.broadcast %c2_i32_15 : i32 to vector<2x4xi32>
    %50 = arith.cmpi eq, %0, %49 : vector<2x4xi32>
    %51 = vector.shape_cast %43 : vector<2x1xf32> to vector<2x1xf32>
    %52 = vector.broadcast %51 : vector<2x1xf32> to vector<2x4xf32>
    %53 = arith.select %50, %52, %36 : vector<2x4xi1>, vector<2x4xf32>
    %c0_16 = arith.constant 0 : index
    %c768 = arith.constant 768 : index
    %54 = vector.load %arg1[%c0_16, %c768] : memref<2x1024xf32, #tpu.memory_space<vmem>>, vector<2x256xf32>
    %cst_17 = arith.constant dense<0xFF800000> : vector<2xf32>
    %55 = vector.multi_reduction <maximumf>, %54, %cst_17 [1] : vector<2x256xf32> to vector<2xf32>
    %56 = vector.shape_cast %55 : vector<2xf32> to vector<2x1xf32>
    %cst_18 = arith.constant dense<0.000000e+00> : vector<2xf32>
    %57 = vector.multi_reduction <add>, %54, %cst_18 [1] : vector<2x256xf32> to vector<2xf32>
    %58 = vector.shape_cast %57 : vector<2xf32> to vector<2x1xf32>
    %cst_19 = arith.constant 3.906250e-03 : f32
    %59 = vector.broadcast %cst_19 : f32 to vector<2x1xf32>
    %60 = arith.mulf %58, %59 : vector<2x1xf32>
    %c3_i32 = arith.constant 3 : i32
    %61 = vector.broadcast %c3_i32 : i32 to vector<2x4xi32>
    %62 = arith.cmpi eq, %0, %61 : vector<2x4xi32>
    %63 = vector.shape_cast %56 : vector<2x1xf32> to vector<2x1xf32>
    %64 = vector.broadcast %63 : vector<2x1xf32> to vector<2x4xf32>
    %65 = arith.select %62, %64, %48 : vector<2x4xi1>, vector<2x4xf32>
    %c3_i32_20 = arith.constant 3 : i32
    %66 = vector.broadcast %c3_i32_20 : i32 to vector<2x4xi32>
    %67 = arith.cmpi eq, %0, %66 : vector<2x4xi32>
    %68 = vector.shape_cast %60 : vector<2x1xf32> to vector<2x1xf32>
    %69 = vector.broadcast %68 : vector<2x1xf32> to vector<2x4xf32>
    %70 = arith.select %67, %69, %53 : vector<2x4xi1>, vector<2x4xf32>
    %c0_21 = arith.constant 0 : index
    %c0_22 = arith.constant 0 : index
    %71 = vector.load %arg2[%c0_21, %c0_22] : memref<4x2xf32, #tpu.memory_space<vmem>>, vector<4x2xf32>
    %cst_23 = arith.constant dense<0.000000e+00> : vector<2x2xf32>
    %72 = tpu.matmul %65, %71, %cst_23 {dimension_numbers = #tpu.dot_dimension_numbers<[1], [0], [0], [1], [0, 0, 1, 1], [], []>, precision = #tpu.contract_precision<fp32>} : vector<2x4xf32>, vector<4x2xf32>, vector<2x2xf32> -> vector<2x2xf32>
    %c0_24 = arith.constant 0 : index
    %c0_25 = arith.constant 0 : index
    %73 = vector.load %arg3[%c0_24, %c0_25] : memref<1x2xf32, #tpu.memory_space<vmem>>, vector<1x2xf32>
    %74 = vector.broadcast %73 : vector<1x2xf32> to vector<2x2xf32>
    %75 = arith.addf %72, %74 : vector<2x2xf32>
    %cst_26 = arith.constant 0.000000e+00 : f32
    %76 = vector.broadcast %cst_26 : f32 to vector<2x2xf32>
    %77 = arith.maximumf %75, %76 : vector<2x2xf32>
    %c0_27 = arith.constant 0 : index
    %c0_28 = arith.constant 0 : index
    %78 = vector.load %arg4[%c0_27, %c0_28] : memref<2x4xf32, #tpu.memory_space<vmem>>, vector<2x4xf32>
    %cst_29 = arith.constant dense<0.000000e+00> : vector<2x4xf32>
    %79 = tpu.matmul %77, %78, %cst_29 {dimension_numbers = #tpu.dot_dimension_numbers<[1], [0], [0], [1], [0, 0, 1, 1], [], []>, precision = #tpu.contract_precision<fp32>} : vector<2x2xf32>, vector<2x4xf32>, vector<2x4xf32> -> vector<2x4xf32>
    %c0_30 = arith.constant 0 : index
    %c0_31 = arith.constant 0 : index
    %80 = vector.load %arg5[%c0_30, %c0_31] : memref<1x4xf32, #tpu.memory_space<vmem>>, vector<1x4xf32>
    %81 = vector.broadcast %80 : vector<1x4xf32> to vector<2x4xf32>
    %82 = arith.addf %79, %81 : vector<2x4xf32>
    %83 = arith.negf %82 : vector<2x4xf32>
    %84 = math.exp %83 : vector<2x4xf32>
    %cst_32 = arith.constant 1.000000e+00 : f32
    %85 = vector.broadcast %cst_32 : f32 to vector<2x4xf32>
    %86 = arith.addf %85, %84 : vector<2x4xf32>
    %87 = arith.divf %85, %86 : vector<2x4xf32>
    %c0_33 = arith.constant 0 : index
    %c0_34 = arith.constant 0 : index
    %88 = vector.load %arg6[%c0_33, %c0_34] : memref<4x2xf32, #tpu.memory_space<vmem>>, vector<4x2xf32>
    %cst_35 = arith.constant dense<0.000000e+00> : vector<2x2xf32>
    %89 = tpu.matmul %70, %88, %cst_35 {dimension_numbers = #tpu.dot_dimension_numbers<[1], [0], [0], [1], [0, 0, 1, 1], [], []>, precision = #tpu.contract_precision<fp32>} : vector<2x4xf32>, vector<4x2xf32>, vector<2x2xf32> -> vector<2x2xf32>
    %c0_36 = arith.constant 0 : index
    %c0_37 = arith.constant 0 : index
    %90 = vector.load %arg7[%c0_36, %c0_37] : memref<1x2xf32, #tpu.memory_space<vmem>>, vector<1x2xf32>
    %91 = vector.broadcast %90 : vector<1x2xf32> to vector<2x2xf32>
    %92 = arith.addf %89, %91 : vector<2x2xf32>
    %cst_38 = arith.constant 0.000000e+00 : f32
    %93 = vector.broadcast %cst_38 : f32 to vector<2x2xf32>
    %94 = arith.maximumf %92, %93 : vector<2x2xf32>
    %c0_39 = arith.constant 0 : index
    %c0_40 = arith.constant 0 : index
    %95 = vector.load %arg8[%c0_39, %c0_40] : memref<2x4xf32, #tpu.memory_space<vmem>>, vector<2x4xf32>
    %cst_41 = arith.constant dense<0.000000e+00> : vector<2x4xf32>
    %96 = tpu.matmul %94, %95, %cst_41 {dimension_numbers = #tpu.dot_dimension_numbers<[1], [0], [0], [1], [0, 0, 1, 1], [], []>, precision = #tpu.contract_precision<fp32>} : vector<2x2xf32>, vector<2x4xf32>, vector<2x4xf32> -> vector<2x4xf32>
    %c0_42 = arith.constant 0 : index
    %c0_43 = arith.constant 0 : index
    %97 = vector.load %arg9[%c0_42, %c0_43] : memref<1x4xf32, #tpu.memory_space<vmem>>, vector<1x4xf32>
    %98 = vector.broadcast %97 : vector<1x4xf32> to vector<2x4xf32>
    %99 = arith.addf %96, %98 : vector<2x4xf32>
    %100 = arith.negf %99 : vector<2x4xf32>
    %101 = math.exp %100 : vector<2x4xf32>
    %cst_44 = arith.constant 1.000000e+00 : f32
    %102 = vector.broadcast %cst_44 : f32 to vector<2x4xf32>
    %103 = arith.addf %102, %101 : vector<2x4xf32>
    %104 = arith.divf %102, %103 : vector<2x4xf32>
    %105 = arith.addf %87, %104 : vector<2x4xf32>
    %106 = arith.negf %105 : vector<2x4xf32>
    %107 = math.exp %106 : vector<2x4xf32>
    %cst_45 = arith.constant 1.000000e+00 : f32
    %108 = vector.broadcast %cst_45 : f32 to vector<2x4xf32>
    %109 = arith.addf %108, %107 : vector<2x4xf32>
    %110 = arith.divf %108, %109 : vector<2x4xf32>
    %c0_i32_46 = arith.constant 0 : i32
    %111 = vector.broadcast %c0_i32_46 : i32 to vector<2x4xi32>
    %112 = arith.cmpi eq, %0, %111 : vector<2x4xi32>
    %cst_47 = arith.constant 0.000000e+00 : f32
    %113 = vector.broadcast %cst_47 : f32 to vector<2x4xf32>
    %114 = arith.select %112, %110, %113 : vector<2x4xi1>, vector<2x4xf32>
    %cst_48 = arith.constant dense<0.000000e+00> : vector<2xf32>
    %115 = vector.multi_reduction <add>, %114, %cst_48 [1] : vector<2x4xf32> to vector<2xf32>
    %116 = vector.shape_cast %115 : vector<2xf32> to vector<2x1xf32>
    %c0_49 = arith.constant 0 : index
    %c0_50 = arith.constant 0 : index
    %117 = vector.load %arg1[%c0_49, %c0_50] : memref<2x1024xf32, #tpu.memory_space<vmem>>, vector<2x256xf32>
    %118 = vector.broadcast %116 : vector<2x1xf32> to vector<2x256xf32>
    %119 = arith.mulf %117, %118 : vector<2x256xf32>
    %c0_51 = arith.constant 0 : index
    %c0_52 = arith.constant 0 : index
    %120 = vector.load %arg10[%c0_51, %c0_52] : memref<2x1024xf32, #tpu.memory_space<vmem>>, vector<2x256xf32>
    tpu.vector_store %arg10[%c0_51, %c0_52], %119 {strides = array<i32>} : memref<2x1024xf32, #tpu.memory_space<vmem>>, vector<2x256xf32>,
    %c1_i32_53 = arith.constant 1 : i32
    %121 = vector.broadcast %c1_i32_53 : i32 to vector<2x4xi32>
    %122 = arith.cmpi eq, %0, %121 : vector<2x4xi32>
    %cst_54 = arith.constant 0.000000e+00 : f32
    %123 = vector.broadcast %cst_54 : f32 to vector<2x4xf32>
    %124 = arith.select %122, %110, %123 : vector<2x4xi1>, vector<2x4xf32>
    %cst_55 = arith.constant dense<0.000000e+00> : vector<2xf32>
    %125 = vector.multi_reduction <add>, %124, %cst_55 [1] : vector<2x4xf32> to vector<2xf32>
    %126 = vector.shape_cast %125 : vector<2xf32> to vector<2x1xf32>
    %c0_56 = arith.constant 0 : index
    %c256_57 = arith.constant 256 : index
    %127 = vector.load %arg1[%c0_56, %c256_57] : memref<2x1024xf32, #tpu.memory_space<vmem>>, vector<2x256xf32>
    %128 = vector.broadcast %126 : vector<2x1xf32> to vector<2x256xf32>
    %129 = arith.mulf %127, %128 : vector<2x256xf32>
    %c0_58 = arith.constant 0 : index
    %c256_59 = arith.constant 256 : index
    %130 = vector.load %arg10[%c0_58, %c256_59] : memref<2x1024xf32, #tpu.memory_space<vmem>>, vector<2x256xf32>
    tpu.vector_store %arg10[%c0_58, %c256_59], %129 {strides = array<i32>} : memref<2x1024xf32, #tpu.memory_space<vmem>>, vector<2x256xf32>,
    %c2_i32_60 = arith.constant 2 : i32
    %131 = vector.broadcast %c2_i32_60 : i32 to vector<2x4xi32>
    %132 = arith.cmpi eq, %0, %131 : vector<2x4xi32>
    %cst_61 = arith.constant 0.000000e+00 : f32
    %133 = vector.broadcast %cst_61 : f32 to vector<2x4xf32>
    %134 = arith.select %132, %110, %133 : vector<2x4xi1>, vector<2x4xf32>
    %cst_62 = arith.constant dense<0.000000e+00> : vector<2xf32>
    %135 = vector.multi_reduction <add>, %134, %cst_62 [1] : vector<2x4xf32> to vector<2xf32>
    %136 = vector.shape_cast %135 : vector<2xf32> to vector<2x1xf32>
    %c0_63 = arith.constant 0 : index
    %c512_64 = arith.constant 512 : index
    %137 = vector.load %arg1[%c0_63, %c512_64] : memref<2x1024xf32, #tpu.memory_space<vmem>>, vector<2x256xf32>
    %138 = vector.broadcast %136 : vector<2x1xf32> to vector<2x256xf32>
    %139 = arith.mulf %137, %138 : vector<2x256xf32>
    %c0_65 = arith.constant 0 : index
    %c512_66 = arith.constant 512 : index
    %140 = vector.load %arg10[%c0_65, %c512_66] : memref<2x1024xf32, #tpu.memory_space<vmem>>, vector<2x256xf32>
    tpu.vector_store %arg10[%c0_65, %c512_66], %139 {strides = array<i32>} : memref<2x1024xf32, #tpu.memory_space<vmem>>, vector<2x256xf32>,
    %c3_i32_67 = arith.constant 3 : i32
    %141 = vector.broadcast %c3_i32_67 : i32 to vector<2x4xi32>
    %142 = arith.cmpi eq, %0, %141 : vector<2x4xi32>
    %cst_68 = arith.constant 0.000000e+00 : f32
    %143 = vector.broadcast %cst_68 : f32 to vector<2x4xf32>
    %144 = arith.select %142, %110, %143 : vector<2x4xi1>, vector<2x4xf32>
    %cst_69 = arith.constant dense<0.000000e+00> : vector<2xf32>
    %145 = vector.multi_reduction <add>, %144, %cst_69 [1] : vector<2x4xf32> to vector<2xf32>
    %146 = vector.shape_cast %145 : vector<2xf32> to vector<2x1xf32>
    %c0_70 = arith.constant 0 : index
    %c768_71 = arith.constant 768 : index
    %147 = vector.load %arg1[%c0_70, %c768_71] : memref<2x1024xf32, #tpu.memory_space<vmem>>, vector<2x256xf32>
    %148 = vector.broadcast %146 : vector<2x1xf32> to vector<2x256xf32>
    %149 = arith.mulf %147, %148 : vector<2x256xf32>
    %c0_72 = arith.constant 0 : index
    %c768_73 = arith.constant 768 : index
    %150 = vector.load %arg10[%c0_72, %c768_73] : memref<2x1024xf32, #tpu.memory_space<vmem>>, vector<2x256xf32>
    tpu.vector_store %arg10[%c0_72, %c768_73], %149 {strides = array<i32>} : memref<2x1024xf32, #tpu.memory_space<vmem>>, vector<2x256xf32>,
    return
  }
  func.func @transform_0(%arg0: i32) -> (i32, i32) {
    %c0_i32 = arith.constant 0 : i32
    %c0_i32_0 = arith.constant 0 : i32
    return %arg0, %c0_i32 : i32, i32
  }
  func.func @transform_1(%arg0: i32) -> (i32, i32) {
    %c0_i32 = arith.constant 0 : i32
    %c0_i32_0 = arith.constant 0 : i32
    %c0_i32_1 = arith.constant 0 : i32
    return %c0_i32, %c0_i32_0 : i32, i32
  }
  func.func @transform_2(%arg0: i32) -> (i32, i32) {
    %c0_i32 = arith.constant 0 : i32
    %c0_i32_0 = arith.constant 0 : i32
    %c0_i32_1 = arith.constant 0 : i32
    return %c0_i32, %c0_i32_0 : i32, i32
  }
  func.func @transform_3(%arg0: i32) -> (i32, i32) {
    %c0_i32 = arith.constant 0 : i32
    %c0_i32_0 = arith.constant 0 : i32
    %c0_i32_1 = arith.constant 0 : i32
    return %c0_i32, %c0_i32_0 : i32, i32
  }
  func.func @transform_4(%arg0: i32) -> (i32, i32) {
    %c0_i32 = arith.constant 0 : i32
    %c0_i32_0 = arith.constant 0 : i32
    %c0_i32_1 = arith.constant 0 : i32
    return %c0_i32, %c0_i32_0 : i32, i32
  }
  func.func @transform_5(%arg0: i32) -> (i32, i32) {
    %c0_i32 = arith.constant 0 : i32
    %c0_i32_0 = arith.constant 0 : i32
    %c0_i32_1 = arith.constant 0 : i32
    return %c0_i32, %c0_i32_0 : i32, i32
  }
  func.func @transform_6(%arg0: i32) -> (i32, i32) {
    %c0_i32 = arith.constant 0 : i32
    %c0_i32_0 = arith.constant 0 : i32
    %c0_i32_1 = arith.constant 0 : i32
    return %c0_i32, %c0_i32_0 : i32, i32
  }
  func.func @transform_7(%arg0: i32) -> (i32, i32) {
    %c0_i32 = arith.constant 0 : i32
    %c0_i32_0 = arith.constant 0 : i32
    %c0_i32_1 = arith.constant 0 : i32
    return %c0_i32, %c0_i32_0 : i32, i32
  }
  func.func @transform_8(%arg0: i32) -> (i32, i32) {
    %c0_i32 = arith.constant 0 : i32
    %c0_i32_0 = arith.constant 0 : i32
    %c0_i32_1 = arith.constant 0 : i32
    return %c0_i32, %c0_i32_0 : i32, i32
  }
  func.func @transform_9(%arg0: i32) -> (i32, i32) {
    %c0_i32 = arith.constant 0 : i32
    %c0_i32_0 = arith.constant 0 : i32
    return %arg0, %c0_i32 : i32, i32
  }
}

</mosaic_0001>

<bundles_post_ra>
// kernel: tpu_custom_call.1
= control target key start
LH: loop header
LB: loop body
LE: loop exit
PB: predicated region body
PF: predicated region fallthrough
CT: control target
= control target key end

     0   :  { %14 = vsyncpa [#allocation3], 0  ;;  %s2627_s0 = inlined_call_operand.hbm [shape: f32[2,1024], index: 0, kind: input, shape index: {}]   ;;  %s2628_s1 = inlined_call_operand.vmem [shape: f32[4,2], index: 1, kind: input, shape index: {}]   ;;  %s2629_s2 = inlined_call_operand.vmem [shape: f32[1,2], index: 2, kind: input, shape index: {}]   ;;  %s2630_s3 = inlined_call_operand.vmem [shape: f32[2,4], index: 3, kind: input, shape index: {}]   ;;  %s2631_s4 = inlined_call_operand.vmem [shape: f32[1,4], index: 4, kind: input, shape index: {}]   ;;  %s2632_s5 = inlined_call_operand.vmem [shape: f32[4,2], index: 5, kind: input, shape index: {}]   ;;  %s2633_s6 = inlined_call_operand.vmem [shape: f32[1,2], index: 6, kind: input, shape index: {}]   ;;  %s2634_s7 = inlined_call_operand.vmem [shape: f32[2,4], index: 7, kind: input, shape index: {}]   ;;  %s2635_s8 = inlined_call_operand.vmem [shape: f32[1,4], index: 8, kind: input, shape index: {}]   ;;  %s2636_s9 = inlined_call_operand.hbm [shape: f32[2,1024], index: 9, kind: output, shape index: {}]  }
   0x1   :  { %15 = vsyncpa [#allocation4], 0  ;;  %s2383_s30 = smov [#allocation2]   ;;  %s2335_s13 = scalar_lea.hbm %s2627_s0, 256 }
   0x2   :  { %s22_s10 = sshll.u32 %s2383_s30, 4  ;;  %p2336_p0 = scmp.ne.s32.totalorder %s2627_s0, %s2335_s13  ;;  %s23_s10 = int_to_ptr.vmem [resolvable:$true] %s22_s10 }
   0x3   :  { %p2339_p1 = scmp.lt.u32.totalorder %s2335_s13, %s2627_s0 }
   0x5   :  { %p2341_p2 = pnand %p2339_p1, %p2336_p0 }
   0x7   :  { %2344 = shalt.err (!%p2341_p2)
}
   0x8   :  { %s2345_s18 = scalar_lea.vmem %s23_s10, 256  ;;  %p2350_p4 = scmp.lt.s32.totalorder %s23_s10, %s23_s10 }
   0x9   :  { %p2346_p3 = scmp.ne.s32.totalorder %s23_s10, %s2345_s18  ;;  %p2351_p5 = scmp.lt.s32.totalorder %s2345_s18, %s2345_s18 }
   0xb   :  { %p2352_p6 = por %p2351_p5, %p2350_p4 }
   0xd   :  { %p2353_p7 = pnand %p2352_p6, %p2346_p3 }
   0xf   :  { %2356 = shalt.err (!%p2353_p7)
}
  0x10   :  { %25 = dma.hbm_to_vmem [thread:$0]  %s2627_s0, 256, %s23_s10, [#allocation3]  }
  0x11   :  { %2379 = dma.done.wait [#allocation3], 256  }
  0x12   :  { %2380 = vsyncadd [#allocation3], 4294967040  ;;  %v45_v0 = vlaneseq  ;;  %v2384_v1 = vmov 1983009808   ;;  %vm59_vm0 = vcmask 1041408   ;;  %vm164_vm1 = vcmask 1043456  }
  0x13   :  { %v50_v2 = vunpack.c.l.s4 %v2384_v1  ;;  %v2454_v6 = vld [vmem:[#allocation2] sm:$0xf]  ;;  %v2096_v7 = vld.sshfl [vmem:[#allocation2 + $0x8] sm:$0x33 pattern:$0x76325410] }
  0x14   :  { %v2451_v3 = vshrl.u32 %v45_v0, 7  ;;  %v109_v9 = vcombine.high %v2096_v7, %v2096_v7  ;;  %v112_v10 = vsel %vm59_vm0, %v2096_v7, -inf  ;;  %v2095_v11 = vld.sshfl [vmem:[#allocation2 + $0x4] sm:$0x33 pattern:$0x76325410] }
  0x15   :  { %v51_v4 = vunpack.c.0.s8 %v50_v2  ;;  %v83_v12 = vcombine.high %v2095_v11, %v2095_v11  ;;  %v2097_v13 = vld.sshfl [vmem:[#allocation2 + $0xc] sm:$0x33 pattern:$0x76325410]  ;;  %v86_v21 = vsel %vm59_vm0, %v2095_v11, -inf  ;;  %v91_v26 = vsel %vm59_vm0, %v2095_v11, 0.0 }
  0x16   :  { %v113_v16 = vsel %vm59_vm0, %v109_v9, -inf  ;;  %v135_v17 = vcombine.high %v2097_v13, %v2097_v13  ;;  %v138_v19 = vsel %vm59_vm0, %v2097_v13, -inf  ;;  %v143_v32 = vsel %vm59_vm0, %v2097_v13, 0.0  ;;  %v152_v39 = vld [vmem:[%s2628_s1] sm:$0xf] }
  0x17   :  { %v54_v5 = vsub.s32 %v51_v4, %v2451_v3  ;;  %v114_v18 = vmax.f32 %v112_v10, %v113_v16  ;;  %v87_v22 = vsel %vm59_vm0, %v83_v12, -inf  ;;  %v92_v27 = vsel %vm59_vm0, %v83_v12, 0.0  ;;  %v1082_v11 = vld [vmem:[%s2632_s5] sm:$0xf] }
  0x18   :  { %v139_v23 = vsel %vm59_vm0, %v135_v17, -inf  ;;  %v88_v28 = vmax.f32 %v86_v21, %v87_v22  ;;  %v93_v31 = vadd.f32 %v92_v27, %v91_v26  ;;  %v144_v33 = vsel %vm59_vm0, %v135_v17, 0.0 }
  0x19   :  { %v55_v8 = vrot.slane %v2454_v6, %v54_v5  ;;  %115 = vmax.xlane.f32.xlu1 %v114_v18  ;;  %v140_v25 = vmax.f32 %v138_v19, %v139_v23  ;;  %v117_v35 = vsel %vm59_vm0, %v2096_v7, 0.0  ;;  %v118_v36 = vsel %vm59_vm0, %v109_v9, 0.0 }
  0x1a   :  { %v145_v37 = vadd.f32 %v144_v33, %v143_v32  ;;  %v119_v38 = vadd.f32 %v118_v36, %v117_v35  ;;  %v2385_v40 = vmov 0.0   ;;  %v166_v41 = vsel %vm164_vm1, %v152_v39, 0 }
  0x1b   :  { %v56_v14 = vcombine.high %v55_v8, %v55_v8  ;;  %v60_v15 = vsel %vm59_vm0, %v55_v8, -inf  ;;  %v65_v29 = vsel %vm59_vm0, %v55_v8, 0.0  ;;  %2153 = vmatprep.subr.mxu0 %v2385_v40  ;;  %vm2386_vm2 = vmmov 0   ;;  %2183 = vmatprep.subr.mxu1 %v2385_v40 }
  0x1c   :  { %2155 = vmatprep.mubr.msk.f32.mxu0 %vm2386_vm2, %v2385_v40  ;;  %v2480_v42 = vand.u32 4294901760, %v166_v41  ;;  %2185 = vmatprep.mubr.msk.f32.mxu1 %vm2386_vm2, %v2385_v40  ;;  %v2487_v43 = vand.u32 127, %v45_v0  ;;  %vm160_vm7 = vcmask 31744   ;;  %v1094_v13 = vsel %vm164_vm1, %v1082_v11, 0 }
  0x1d   :  { %v61_v20 = vsel %vm59_vm0, %v56_v14, -inf  ;;  %v66_v30 = vsel %vm59_vm0, %v56_v14, 0.0  ;;  %141 = vmax.xlane.f32.xlu1 %v140_v25  ;;  %v615_v25 = vld [vmem:[%s2630_s3] sm:$0x3]  ;;  %vm623_vm8 = vcmask 15360   ;;  %vm2017_vm9 = vcmask 25600  }
  0x1e   :  { %v62_v24 = vmax.f32 %v60_v15, %v61_v20  ;;  %v67_v34 = vadd.f32 %v66_v30, %v65_v29  ;;  %2154 = vmatpush3.msra.mxu0 %v2480_v42  ;;  %vm71_vm3 = vcmp.eq.s32.totalorder %v2487_v43, 0  ;;  %vm97_vm4 = vcmp.eq.s32.totalorder %v2487_v43, 1 }
  0x1f   :  { %2158 = vmatprep.subr.mxu0 %v2385_v40  ;;  %vm123_vm5 = vcmp.eq.s32.totalorder %v2487_v43, 2  ;;  %vm149_vm6 = vcmp.eq.s32.totalorder %v2487_v43, 3  ;;  %v246_v49 = vsub.f32 %v166_v41, %v2480_v42  ;;  %v1097_v15 = vand.u32 4294901760, %v1094_v13 }
  0x20   :  { %63 = vmax.xlane.f32.xlu0 %v62_v24  ;;  %v628_v26 = vsel %vm59_vm0, %v615_v25, 0 }
  0x21   :  { %94 = vadd.xlane.f32.xlu1 %v93_v31  ;;  %v247_v54 = vand.u32 4294901760, %v246_v49  ;;  %v1174_v17 = vsub.f32 %v1094_v13, %v1097_v15  ;;  %v631_v27 = vand.u32 4294901760, %v628_v26 }
  0x23   :  { %v248_v57 = vsub.f32 %v246_v49, %v247_v54  ;;  %v1175_v19 = vand.u32 4294901760, %v1174_v17  ;;  %2184 = vmatpush3.msra.mxu1 %v631_v27  ;;  %v708_v32 = vsub.f32 %v628_v26, %v631_v27 }
  0x24   :  { %89 = vmax.xlane.f32.xlu0 %v88_v28  ;;  %2188 = vmatprep.subr.mxu1 %v2385_v40  ;;  %v2098_v28 = vld [vmem:[%s2629_s2] ss:$0 sm:$0xff] }
  0x25   :  { %146 = vadd.xlane.f32.xlu1 %v145_v37  ;;  %v249_v60 = vand.u32 4294901760, %v248_v57  ;;  %v1176_v21 = vsub.f32 %v1174_v17, %v1175_v19  ;;  %v709_v35 = vand.u32 4294901760, %v708_v32 }
  0x27   :  { %v1177_v23 = vand.u32 4294901760, %v1176_v21 }
  0x28   :  { %68 = vadd.xlane.f32.xlu0 %v67_v34 }
  0x2c   :  { %120 = vadd.xlane.f32.xlu0 %v119_v38  ;;  %v710_v38 = vsub.f32 %v708_v32, %v709_v35 }
  0xa6   :  { %v116_v44 = vpop.xlane.xlu1 %115 }
  0xaa   :  { %v142_v48 = vpop.xlane.xlu1 %141 }
  0xad   :  { %v64_v45 = vpop.xlane.xlu0 %63 }
  0xae   :  { %v72_v46 = vsel %vm71_vm3, %v64_v45, 0.0  ;;  %v95_v0 = vpop.xlane.xlu1 %94  ;;  %v1543_v45 = vld [vmem:[%s2634_s7] sm:$0x3] }
  0xaf   :  { %v96_v1 = vmul.f32 0.00390625, %v95_v0 }
  0xb1   :  { %v90_v47 = vpop.xlane.xlu0 %89 }
  0xb2   :  { %v98_v50 = vsel %vm97_vm4, %v90_v47, %v72_v46  ;;  %v147_v7 = vpop.xlane.xlu1 %146  ;;  %v1555_v46 = vsel %vm59_vm0, %v1543_v45, 0 }
  0xb3   :  { %v124_v51 = vsel %vm123_vm5, %v116_v44, %v98_v50  ;;  %v148_v9 = vmul.f32 0.00390625, %v147_v7  ;;  %v1558_v47 = vand.u32 4294901760, %v1555_v46 }
  0xb4   :  { %v150_v52 = vsel %vm149_vm6, %v142_v48, %v124_v51  ;;  %v2101_v48 = vld [vmem:[%s2633_s6] ss:$0 sm:$0xff] }
  0xb5   :  { %v162_v53 = vsel %vm160_vm7, %v150_v52, 0  ;;  %v69_v62 = vpop.xlane.xlu0 %68  ;;  %v1635_v52 = vsub.f32 %v1555_v46, %v1558_v47 }
  0xb6   :  { %v234_v55 = vand.u32 4294901760, %v162_v53  ;;  %v70_v63 = vmul.f32 0.00390625, %v69_v62 }
  0xb8   :  { %v235_v56 = vsub.f32 %v162_v53, %v234_v55  ;;  %v73_v4 = vsel %vm71_vm3, %v70_v63, 0.0 }
  0xb9   :  { %v121_v2 = vpop.xlane.xlu0 %120  ;;  %v99_v8 = vsel %vm97_vm4, %v96_v1, %v73_v4  ;;  %v2099_v1 = vld [vmem:[%s2631_s4] ss:$0 sm:$0xff]  ;;  %s2388_s4 = smov [#allocation5]  }
  0xba   :  { %v236_v58 = vand.u32 4294901760, %v235_v56  ;;  %v122_v5 = vmul.f32 0.00390625, %v121_v2 }
  0xbc   :  { %v237_v59 = vsub.f32 %v235_v56, %v236_v58  ;;  %v125_v10 = vsel %vm123_vm5, %v122_v5, %v99_v8  ;;  %v2102_v5 = vld [vmem:[%s2635_s8] ss:$0 sm:$0xff]  ;;  %s2086_s8 = sshll.u32 %s2388_s4, 4  ;;  %s2087_s8 = int_to_ptr.vmem [resolvable:$true] %s2086_s8 }
  0xbd   :  { %v151_v12 = vsel %vm149_vm6, %v148_v9, %v125_v10  ;;  %s2357_s30 = scalar_lea.vmem %s2087_s8, 256  ;;  %p2362_p9 = scmp.lt.s32.totalorder %s2087_s8, %s2087_s8 }
  0xbe   :  { %v238_v61 = vand.u32 4294901760, %v237_v59  ;;  %v1091_v14 = vsel %vm160_vm7, %v151_v12, 0  ;;  %p2358_p8 = scmp.ne.s32.totalorder %s2087_s8, %s2357_s30  ;;  %p2363_p10 = scmp.lt.s32.totalorder %s2357_s30, %s2357_s30 }
  0xbf   :  { %v1162_v16 = vand.u32 4294901760, %v1091_v14 }
  0xc0   :  { %2156 = vmatmul.mubr.f32.vlgmr.msra.gmra.mrb[0].mxu0 %v238_v61  ;;  %p2364_p11 = por %p2363_p10, %p2362_p9 }
  0xc1   :  { %2159 = vmatpush3.msra.mxu0 %v249_v60  ;;  %2160 = vmatprep.mubr.msk.f32.mxu0 %vm2386_vm2, %v2385_v40  ;;  %v1163_v18 = vsub.f32 %v1091_v14, %v1162_v16 }
  0xc2   :  { %2163 = vmatprep.subr.mxu0 %v2385_v40  ;;  %p2365_p12 = pnand %p2364_p11, %p2358_p8 }
  0xc3   :  { %v1164_v20 = vand.u32 4294901760, %v1163_v18 }
  0xc5   :  { %v1165_v22 = vsub.f32 %v1163_v18, %v1164_v20 }
  0xc7   :  { %v1166_v24 = vand.u32 4294901760, %v1165_v22 }
  0xc8   :  { %2161 = vmatmul.mubr.f32.vlgmr.msra.gmra.mrb[0].mxu0 %v234_v55 }
  0xc9   :  { %2164 = vmatpush3.msra.mxu0 %v246_v49  ;;  %2165 = vmatprep.mubr.msk.f32.mxu0 %vm2386_vm2, %v2385_v40 }
  0xca   :  { %2168 = vmatprep.subr.mxu0 %v2385_v40 }
  0xd0   :  { %2166 = vmatmul.mubr.f32.vlgmr.msra.gmra.mrb[0].mxu0 %v235_v56 }
  0xd1   :  { %2169 = vmatpush3.msra.mxu0 %v2480_v42  ;;  %2170 = vmatprep.mubr.msk.f32.mxu0 %vm2386_vm2, %v2385_v40 }
  0xd2   :  { %2173 = vmatprep.subr.mxu0 %v2385_v40 }
  0xd8   :  { %2171 = vmatmul.mubr.f32.vlgmr.msra.gmra.mrb[0].mxu0 %v236_v58 }
  0xd9   :  { %2174 = vmatpush3.msra.mxu0 %v247_v54  ;;  %2175 = vmatprep.mubr.msk.f32.mxu0 %vm2386_vm2, %v2385_v40 }
  0xda   :  { %2178 = vmatprep.subr.mxu0 %v2385_v40 }
  0xe0   :  { %2176 = vmatmul.mubr.f32.vlgmr.msra.gmra.mrb[0].mxu0 %v234_v55 }
  0xe1   :  { %2179 = vmatpush3.msra.mxu0 %v2480_v42  ;;  %2180 = vmatprep.mubr.msk.f32.mxu0 %vm2386_vm2, %v2385_v40  ;;  %v711_v42 = vand.u32 4294901760, %v710_v38 }
  0xe2   :  { %2213 = vmatprep.subr.mxu0 %v2385_v40 }
  0xe8   :  { %2181 = vmatmul.mubr.f32.vlgmr.msra.gmra.mrb[0].mxu0 %v234_v55  ;;  %v1636_v55 = vand.u32 4294901760, %v1635_v52 }
  0xe9   :  { %2214 = vmatpush3.msra.mxu0 %v1097_v15  ;;  %2215 = vmatprep.mubr.msk.f32.mxu0 %vm2386_vm2, %v2385_v40 }
  0xea   :  { %2218 = vmatprep.subr.mxu0 %v2385_v40  ;;  %v1637_v58 = vsub.f32 %v1635_v52, %v1636_v55 }
  0xec   :  { %2216 = vmatmul.mubr.f32.vlgmr.msra.gmra.mrb[2].mxu0 %v1166_v24  ;;  %v1638_v61 = vand.u32 4294901760, %v1637_v58 }
  0xed   :  { %2219 = vmatpush3.msra.mxu0 %v1177_v23  ;;  %2220 = vmatprep.mubr.msk.f32.mxu0 %vm2386_vm2, %v2385_v40 }
  0xee   :  { %2223 = vmatprep.subr.mxu0 %v2385_v40 }
  0xf4   :  { %2221 = vmatmul.mubr.f32.vlgmr.msra.gmra.mrb[2].mxu0 %v1162_v16 }
  0xf5   :  { %2224 = vmatpush3.msra.mxu0 %v1174_v17  ;;  %2225 = vmatprep.mubr.msk.f32.mxu0 %vm2386_vm2, %v2385_v40 }
  0xf6   :  { %2228 = vmatprep.subr.mxu0 %v2385_v40 }
  0xfc   :  { %2226 = vmatmul.mubr.f32.vlgmr.msra.gmra.mrb[2].mxu0 %v1163_v18 }
  0xfd   :  { %2229 = vmatpush3.msra.mxu0 %v1097_v15  ;;  %2230 = vmatprep.mubr.msk.f32.mxu0 %vm2386_vm2, %v2385_v40 }
  0xfe   :  { %2233 = vmatprep.subr.mxu0 %v2385_v40 }
 0x104   :  { %2231 = vmatmul.mubr.f32.vlgmr.msra.gmra.mrb[2].mxu0 %v1164_v20 }
 0x105   :  { %2234 = vmatpush3.msra.mxu0 %v1175_v19  ;;  %2235 = vmatprep.mubr.msk.f32.mxu0 %vm2386_vm2, %v2385_v40 }
 0x106   :  { %2238 = vmatprep.subr.mxu0 %v2385_v40 }
 0x10c   :  { %2236 = vmatmul.mubr.f32.vlgmr.msra.gmra.mrb[2].mxu0 %v1162_v16 }
 0x10d   :  { %2239 = vmatpush3.msra.mxu0 %v1097_v15  ;;  %2240 = vmatprep.mubr.msk.f32.mxu0 %vm2386_vm2, %v2385_v40 }
 0x114   :  { %2241 = vmatmul.mubr.f32.vlgmr.msra.gmra.mrb[2].mxu0 %v1162_v16 }
 0x1bb   :  { %v610_v29 = vpop.f32.mrb[0].mxu0 }
 0x1bc   :  { %v2273_v30 = vadd.f32 %v2098_v28, %v610_v29  ;;  %v2182_v31 = vpop.f32.mrb[1].mxu0  ;;  %v2387_v29 = vmov 269488144  }
 0x1be   :  { %v614_v33 = vmax.f32 %v2273_v30, 0.0  ;;  %v2023_v30 = vunpack.c.l.s4 %v2387_v29 }
 0x1c0   :  { %v625_v34 = vsel %vm623_vm8, %v614_v33, 0  ;;  %v2024_v31 = vunpack.c.0.s8 %v2023_v30  ;;  %v2036_v33 = vld [vmem:[#allocation2 + $0x4] sm:$0xf] }
 0x1c1   :  { %v696_v36 = vand.u32 4294901760, %v625_v34 }
 0x1c3   :  { %v697_v37 = vsub.f32 %v625_v34, %v696_v36 }
 0x1c5   :  { %v698_v39 = vand.u32 4294901760, %v697_v37 }
 0x1c7   :  { %v699_v41 = vsub.f32 %v697_v37, %v698_v39 }
 0x1c9   :  { %v700_v44 = vand.u32 4294901760, %v699_v41  ;;  %v2068_v41 = vld [vmem:[#allocation2 + $0xc] sm:$0xf] }
 0x1cb   :  { %2186 = vmatmul.mubr.f32.vlgmr.msra.gmra.mrb[0].mxu1 %v700_v44 }
 0x1cc   :  { %2189 = vmatpush3.msra.mxu1 %v711_v42  ;;  %2190 = vmatprep.mubr.msk.f32.mxu1 %vm2386_vm2, %v2385_v40  ;;  %v2052_v42 = vld [vmem:[#allocation2 + $0x8] sm:$0xf] }
 0x1cd   :  { %2193 = vmatprep.subr.mxu1 %v2385_v40 }
 0x1d3   :  { %2191 = vmatmul.mubr.f32.vlgmr.msra.gmra.mrb[0].mxu1 %v696_v36 }
 0x1d4   :  { %2194 = vmatpush3.msra.mxu1 %v708_v32  ;;  %2195 = vmatprep.mubr.msk.f32.mxu1 %vm2386_vm2, %v2385_v40  ;;  %v2027_v32 = vsub.s32 %v2024_v31, %v2451_v3 }
 0x1d5   :  { %2198 = vmatprep.subr.mxu1 %v2385_v40 }
 0x1db   :  { %2196 = vmatmul.mubr.f32.vlgmr.msra.gmra.mrb[0].mxu1 %v697_v37 }
 0x1dc   :  { %2199 = vmatpush3.msra.mxu1 %v631_v27  ;;  %2200 = vmatprep.mubr.msk.f32.mxu1 %vm2386_vm2, %v2385_v40 }
 0x1dd   :  { %2203 = vmatprep.subr.mxu1 %v2385_v40 }
 0x1e3   :  { %2201 = vmatmul.mubr.f32.vlgmr.msra.gmra.mrb[0].mxu1 %v698_v39 }
 0x1e4   :  { %2204 = vmatpush3.msra.mxu1 %v709_v35  ;;  %2205 = vmatprep.mubr.msk.f32.mxu1 %vm2386_vm2, %v2385_v40 }
 0x1e5   :  { %2208 = vmatprep.subr.mxu1 %v2385_v40 }
 0x1e7   :  { %v1538_v49 = vpop.f32.mrb[2].mxu0 }
 0x1e8   :  { %v2275_v50 = vadd.f32 %v2101_v48, %v1538_v49  ;;  %v2242_v51 = vpop.f32.mrb[3].mxu0 }
 0x1ea   :  { %v1542_v53 = vmax.f32 %v2275_v50, 0.0 }
 0x1eb   :  { %2206 = vmatmul.mubr.f32.vlgmr.msra.gmra.mrb[0].mxu1 %v696_v36 }
 0x1ec   :  { %v1552_v54 = vsel %vm623_vm8, %v1542_v53, 0  ;;  %2209 = vmatpush3.msra.mxu1 %v631_v27  ;;  %2210 = vmatprep.mubr.msk.f32.mxu1 %vm2386_vm2, %v2385_v40 }
 0x1ed   :  { %v1623_v56 = vand.u32 4294901760, %v1552_v54  ;;  %2243 = vmatprep.subr.mxu1 %v2385_v40 }
 0x1ef   :  { %v1624_v57 = vsub.f32 %v1552_v54, %v1623_v56 }
 0x1f1   :  { %v1625_v59 = vand.u32 4294901760, %v1624_v57 }
 0x1f3   :  { %2211 = vmatmul.mubr.f32.vlgmr.msra.gmra.mrb[0].mxu1 %v696_v36  ;;  %v1626_v60 = vsub.f32 %v1624_v57, %v1625_v59 }
 0x1f4   :  { %2244 = vmatpush3.msra.mxu1 %v1558_v47  ;;  %2245 = vmatprep.mubr.msk.f32.mxu1 %vm2386_vm2, %v2385_v40 }
 0x1f5   :  { %2248 = vmatprep.subr.mxu1 %v2385_v40  ;;  %v1627_v62 = vand.u32 4294901760, %v1626_v60 }
 0x1f7   :  { %2246 = vmatmul.mubr.f32.vlgmr.msra.gmra.mrb[2].mxu1 %v1627_v62 }
 0x1f8   :  { %2249 = vmatpush3.msra.mxu1 %v1638_v61  ;;  %2250 = vmatprep.mubr.msk.f32.mxu1 %vm2386_vm2, %v2385_v40 }
 0x1f9   :  { %2253 = vmatprep.subr.mxu1 %v2385_v40 }
 0x1ff   :  { %2251 = vmatmul.mubr.f32.vlgmr.msra.gmra.mrb[2].mxu1 %v1623_v56 }
 0x200   :  { %2254 = vmatpush3.msra.mxu1 %v1635_v52  ;;  %2255 = vmatprep.mubr.msk.f32.mxu1 %vm2386_vm2, %v2385_v40 }
 0x201   :  { %2258 = vmatprep.subr.mxu1 %v2385_v40 }
 0x207   :  { %2256 = vmatmul.mubr.f32.vlgmr.msra.gmra.mrb[2].mxu1 %v1624_v57 }
 0x208   :  { %2259 = vmatpush3.msra.mxu1 %v1558_v47  ;;  %2260 = vmatprep.mubr.msk.f32.mxu1 %vm2386_vm2, %v2385_v40 }
 0x209   :  { %2263 = vmatprep.subr.mxu1 %v2385_v40 }
 0x20f   :  { %2261 = vmatmul.mubr.f32.vlgmr.msra.gmra.mrb[2].mxu1 %v1625_v59 }
 0x210   :  { %2264 = vmatpush3.msra.mxu1 %v1636_v55  ;;  %2265 = vmatprep.mubr.msk.f32.mxu1 %vm2386_vm2, %v2385_v40 }
 0x211   :  { %2268 = vmatprep.subr.mxu1 %v2385_v40 }
 0x217   :  { %2266 = vmatmul.mubr.f32.vlgmr.msra.gmra.mrb[2].mxu1 %v1623_v56 }
 0x218   :  { %2269 = vmatpush3.msra.mxu1 %v1558_v47  ;;  %2270 = vmatprep.mubr.msk.f32.mxu1 %vm2386_vm2, %v2385_v40 }
 0x21f   :  { %2271 = vmatmul.mubr.f32.vlgmr.msra.gmra.mrb[2].mxu1 %v1623_v56 }
 0x2c6   :  { %v1072_v63 = vpop.f32.mrb[0].mxu1 }
 0x2c7   :  { %v2212_v0 = vpop.f32.mrb[1].mxu1  ;;  %v2274_v2 = vadd.f32 %v2099_v1, %v1072_v63 }
 0x2c9   :  { %v2100_v4 = vmul.f32 -1.442695, %v2274_v2 }
 0x2cb   :  { %2323 = vpow2.f32 %v2100_v4 }
 0x2d5   :  { %v2324_v40 = vpop.eup %2323 }
 0x2d6   :  { %v1079_v11 = vadd.f32 1.0, %v2324_v40 }
 0x2f2   :  { %v1999_v7 = vpop.f32.mrb[2].mxu1 }
 0x2f3   :  { %v2276_v8 = vadd.f32 %v2102_v5, %v1999_v7  ;;  %v2272_v9 = vpop.f32.mrb[3].mxu1 }
 0x2f5   :  { %v2103_v10 = vmul.f32 -1.442695, %v2276_v8 }
 0x2f7   :  { %2325 = vpow2.f32 %v2103_v10 }
 0x2f8   :  { %2327 = vrcp.f32 %v1079_v11 }
 0x301   :  { %v2326_v12 = vpop.eup %2325 }
 0x302   :  { %v2006_v13 = vadd.f32 1.0, %v2326_v12  ;;  %v2328_v14 = vpop.eup %2327 }
 0x304   :  { %2329 = vrcp.f32 %v2006_v13 }
 0x30e   :  { %v2330_v15 = vpop.eup %2329 }
 0x30f   :  { %v2009_v16 = vadd.f32 %v2330_v15, %v2328_v14 }
 0x311   :  { %v2104_v17 = vmul.f32 -1.442695, %v2009_v16 }
 0x313   :  { %2331 = vpow2.f32 %v2104_v17 }
 0x31d   :  { %v2332_v18 = vpop.eup %2331 }
 0x31e   :  { %v2013_v19 = vadd.f32 1.0, %v2332_v18 }
 0x320   :  { %2333 = vrcp.f32 %v2013_v19 }
 0x32a   :  { %v2334_v20 = vpop.eup %2333 }
 0x32b   :  { %v2032_v21 = vsel %vm97_vm4, %v2334_v20, 0.0  ;;  %v2016_v22 = vsel %vm71_vm3, %v2334_v20, 0.0  ;;  %v2064_v25 = vsel %vm149_vm6, %v2334_v20, 0.0  ;;  %v2048_v26 = vsel %vm123_vm5, %v2334_v20, 0.0 }
 0x32c   :  { %v2033_v23 = vsel %vm2017_vm9, %v2032_v21, 0.0  ;;  %v2018_v24 = vsel %vm2017_vm9, %v2016_v22, 0.0  ;;  %v2065_v27 = vsel %vm2017_vm9, %v2064_v25, 0.0  ;;  %v2049_v28 = vsel %vm2017_vm9, %v2048_v26, 0.0 }
 0x32d   :  { %2034 = vadd.xlane.f32.xlu1 %v2033_v23  ;;  %2019 = vadd.xlane.f32.xlu0 %v2018_v24 }
 0x331   :  { %2066 = vadd.xlane.f32.xlu1 %v2065_v27  ;;  %2050 = vadd.xlane.f32.xlu0 %v2049_v28 }
 0x3ba   :  { %v2035_v34 = vpop.xlane.xlu1 %2034  ;;  %v2020_v35 = vpop.xlane.xlu0 %2019 }
 0x3bb   :  { %v2044_v36 = vrot.slane %v2035_v34, %v2027_v32  ;;  %v2028_v37 = vrot.slane %v2020_v35, %v2027_v32 }
 0x3bd   :  { %v2046_v38 = vmul.f32 %v2044_v36, %v2036_v33  ;;  %v2030_v39 = vmul.f32 %v2028_v37, %v2454_v6 }
 0x3be   :  { %v2067_v43 = vpop.xlane.xlu1 %2066  ;;  %v2051_v44 = vpop.xlane.xlu0 %2050 }
 0x3bf   :  { %2047 = vst [vmem:[#allocation5 + $0x4] sm:$0xf] %v2046_v38  ;;  %2031 = vst [vmem:[#allocation5] sm:$0xf] %v2030_v39  ;;  %v2076_v45 = vrot.slane %v2067_v43, %v2027_v32  ;;  %v2060_v46 = vrot.slane %v2051_v44, %v2027_v32 }
 0x3c1   :  { %v2078_v47 = vmul.f32 %v2076_v45, %v2068_v41  ;;  %v2062_v3 = vmul.f32 %v2060_v46, %v2052_v42 }
 0x3c3   :  { %2079 = vst [vmem:[#allocation5 + $0xc] sm:$0xf] %v2078_v47  ;;  %2063 = vst [vmem:[#allocation5 + $0x8] sm:$0xf] %v2062_v3 }
 0x3c4   :  { %2368 = shalt.err (!%p2365_p12)
}
 0x3c5   :  { %s2369_s12 = scalar_lea.hbm %s2636_s9, 256 }
 0x3c6   :  { %p2370_p13 = scmp.ne.s32.totalorder %s2636_s9, %s2369_s12  ;;  %p2373_p0 = scmp.lt.u32.totalorder %s2369_s12, %s2636_s9 }
 0x3c8   :  { %p2375_p1 = pnand %p2373_p0, %p2370_p13 }
 0x3ca   :  { %2378 = shalt.err (!%p2375_p1)
}
 0x3cb   :  { %2089 = dma.vmem_to_hbm [thread:$0]  %s2087_s8, 256, %s2636_s9, [#allocation4]  }
 0x3cc   :  { %2381 = dma.done.wait [#allocation4], 256  }
 0x3cd   :  { %2382 = vsyncadd [#allocation4], 4294967040 }
 0x3ce   :  { %2093 = vsyncpa [#allocation3], 1 }
 0x3cf   :  { %2094 = vsyncpa [#allocation4], 1 }

</bundles_post_ra>
